<compile_context>
chip_gen: v6e
topology: v6e:2x2x1
jax: 0.10.0
libtpu: 0.0.40
codegen_flags: <defaults>
</compile_context>

<pallas_src>
import jax
import jax.numpy as jnp
from jax.experimental import pallas as pl
from jax.experimental.pallas import tpu as pltpu


def _round_up(v, m):
    return (v + m - 1) // m * m


def _detect_hw():
    """Returns (mxu_lane_multiple, physical_vmem_bytes) for the local TPU."""
    lane, vmem = 256, 128 * 1024 * 1024
    try:
        kind = jax.devices()[0].device_kind.lower()
    except Exception:
        kind = ""
    if any(t in kind for t in ("v2", "v3", "v4", "v5")):
        lane = 128  # 128x128 MXU generations
    if "v7" in kind:
        vmem = 64 * 1024 * 1024
    try:
        info = pltpu.get_tpu_info()
        vmem = int(getattr(info, "vmem_capacity_bytes", vmem))
    except Exception:
        pass
    return lane, vmem


def _ffn_kernel(x_ref, w1_ref, b1_ref, w2_ref, b2_ref, o_ref, acc_ref):
    k = pl.program_id(1)

    @pl.when(k == 0)
    def _():
        acc_ref[...] = jnp.zeros_like(acc_ref)

    # fc1 on this hidden chunk: cast the x tile to bf16 in-kernel (nearly free on
    # the VPU under MXU work); bf16 x bf16 -> f32 accumulation on the MXU.
    x_bf = x_ref[...].astype(jnp.bfloat16)
    h = jnp.dot(x_bf, w1_ref[...], preferred_element_type=jnp.float32)
    # bias + ReLU in f32 on the VPU (b1 chunk is (1, tk) -> broadcasts over rows).
    h = jnp.maximum(h + b1_ref[...], 0.0)
    # dropout (p=0.1) in eval mode == identity.
    # TODO(synk): training-mode dropout (pltpu.prng_seed + stateful_bernoulli) not emitted.
    # fc2 partial product for this hidden chunk, accumulated in f32 scratch.
    acc_ref[...] += jnp.dot(h.astype(w2_ref.dtype), w2_ref[...],
                            preferred_element_type=jnp.float32)

    @pl.when(k == pl.num_programs(1) - 1)
    def _():
        o_ref[...] = (acc_ref[...] + b2_ref[...]).astype(o_ref.dtype)


def prepare_ffn_params(w1, b1, w2, b2, *, max_hidden_block=None):
    """One-time weight preprocessing: pad to MXU-aligned shapes and cast to bf16.

    Hoisted out of the per-call hot path (weight-stationary inference should call
    this once and reuse the result with feed_forward_prepared).
    """
    lane, vmem_phys = _detect_hw()
    vmem_budget = (vmem_phys * 3) // 4

    in_size, hid_size = w1.shape
    out_size = w2.shape[1]
    in_p = _round_up(in_size, lane)
    out_p = _round_up(out_size, lane)
    hid_lane = _round_up(hid_size, lane)

    def weight_bytes(tk, bufs):
        return bufs * ((in_p * tk + tk * out_p) * 2 + (tk + out_p) * 4)

    # Hidden-dim tile: keep the whole hidden dim resident when the single-buffered
    # weights fit in ~half the VMEM budget; otherwise stream hidden chunks
    # (double-buffered) and accumulate fc2 partials in f32 scratch.
    if max_hidden_block is not None:
        tk = min(_round_up(max_hidden_block, lane), hid_lane)
    elif weight_bytes(hid_lane, 1) <= vmem_budget // 2:
        tk = hid_lane
    else:
        tk = hid_lane
        while tk > lane and weight_bytes(tk, 2) > vmem_budget // 2:
            tk = max(lane, _round_up(tk // 2, lane))
    hid_p = _round_up(hid_lane, tk)  # whole multiple of the hidden tile

    # Zero padding is semantics-preserving: padded x cols hit zero w1 rows; padded
    # hidden cols give h = relu(0 + 0) = 0, killed by zero w2 rows; padded output
    # cols / batch rows are sliced off in the wrapper.
    w1_p = jnp.pad(w1, ((0, in_p - in_size), (0, hid_p - hid_size))).astype(jnp.bfloat16)
    w2_p = jnp.pad(w2, ((0, hid_p - hid_size), (0, out_p - out_size))).astype(jnp.bfloat16)
    b1_p = jnp.pad(b1, (0, hid_p - hid_size)).reshape(1, hid_p).astype(jnp.float32)
    b2_p = jnp.pad(b2, (0, out_p - out_size)).reshape(1, out_p).astype(jnp.float32)

    return dict(
        w1=w1_p, b1=b1_p, w2=w2_p, b2=b2_p,
        dims=(in_size, hid_size, out_size),
        padded=(in_p, hid_p, out_p),
        tk=tk, lane=lane, vmem_budget=vmem_budget,
    )


def feed_forward_prepared(x, params, *, block_m=None):
    """Hot path: x [B, in] (f32), params from prepare_ffn_params."""
    B, in_size = x.shape
    in0, hid0, out0 = params["dims"]
    assert in_size == in0, "input feature size mismatch"
    in_p, hid_p, out_p = params["padded"]
    tk = params["tk"]
    lane = params["lane"]
    vmem_budget = params["vmem_budget"]
    out_dtype = x.dtype
    nk = hid_p // tk

    # --- batch (M) tile: >=16 for bf16 sublane packing, target MXU-sized tiles ---
    target_m = 256 if lane >= 256 else 128
    tm = min(block_m if block_m is not None else target_m, _round_up(B, 16))
    tm = max(16, _round_up(tm, 16))

    w_bufs = 1 if nk == 1 else 2

    def vmem_need(tm_):
        act = 2 * tm_ * in_p * 4 + 2 * tm_ * out_p * 4          # pipelined x / out tiles
        scr = tm_ * out_p * 4                                     # f32 accumulator scratch
        h = tm_ * tk * 4 + tm_ * tk * 2 + tm_ * in_p * 2          # f32 h + bf16 cast copies
        w = w_bufs * ((in_p * tk + tk * out_p) * 2 + (tk + out_p) * 4)
        return act + scr + h + w

    while tm > 16 and vmem_need(tm) > (vmem_budget * 9) // 10:
        tm = max(16, _round_up(tm // 2, 16))

    b_p = _round_up(B, tm)
    x_p = jnp.pad(x, ((0, b_p - B), (0, in_p - in_size)))  # stays f32; bf16 cast in-kernel

    grid = (b_p // tm, nk)

    flops = 2 * B * (in0 * hid0 + hid0 * out0)
    bytes_accessed = int(
        x.size * x.dtype.itemsize
        + params["w1"].size * 2 + params["w2"].size * 2
        + params["b1"].size * 4 + params["b2"].size * 4
        + B * out0 * jnp.dtype(out_dtype).itemsize
    )
    cost = pl.CostEstimate(flops=flops, transcendentals=0, bytes_accessed=bytes_accessed)

    vmem_limit = int(min(vmem_budget, max(vmem_need(tm) * 2, 32 * 1024 * 1024)))

    def run(weight_pipeline_mode):
        def wspec(shape, index_map):
            if weight_pipeline_mode is None:
                return pl.BlockSpec(shape, index_map)
            return pl.BlockSpec(shape, index_map, pipeline_mode=weight_pipeline_mode)

        return pl.pallas_call(
            _ffn_kernel,
            out_shape=jax.ShapeDtypeStruct((b_p, out_p), out_dtype),
            grid_spec=pltpu.PrefetchScalarGridSpec(
                num_scalar_prefetch=0,
                grid=grid,
                in_specs=[
                    pl.BlockSpec((tm, in_p), lambda i, k: (i, 0)),  # x tile (pipelined over batch)
                    wspec((in_p, tk), lambda i, k: (0, k)),          # w1 hidden chunk
                    wspec((1, tk), lambda i, k: (0, k)),             # b1 hidden chunk
                    wspec((tk, out_p), lambda i, k: (k, 0)),         # w2 hidden chunk
                    wspec((1, out_p), lambda i, k: (0, 0)),          # b2 (resident)
                ],
                out_specs=pl.BlockSpec((tm, out_p), lambda i, k: (i, 0)),
                scratch_shapes=[pltpu.VMEM((tm, out_p), jnp.float32)],
            ),
            compiler_params=pltpu.CompilerParams(
                dimension_semantics=("parallel", "arbitrary"),
                vmem_limit_bytes=vmem_limit,
            ),
            cost_estimate=cost,
        )(x_p, params["w1"], params["b1"], params["w2"], params["b2"])

    if nk == 1:
        # Constant index maps on the weights -> request single buffering to halve
        # resident weight VMEM; fall back to default double-buffering if rejected.
        try:
            out_padded = run(pl.Buffered(1))
        except Exception:
            out_padded = run(None)
    else:
        out_padded = run(None)

    return out_padded[:B, :out0]


def feed_forward(x, w1, b1, w2, b2, *, block_m=None, max_hidden_block=None):
    """Convenience wrapper (prepares weights per call). For repeated inference,
    call prepare_ffn_params() once and reuse with feed_forward_prepared()."""
    params = prepare_ffn_params(w1, b1, w2, b2, max_hidden_block=max_hidden_block)
    return feed_forward_prepared(x, params, block_m=block_m)


def _linear_init(key, fan_in, fan_out, dtype=jnp.float32):
    # Matches nn.Linear default init: U(-1/sqrt(fan_in), 1/sqrt(fan_in))
    kw, kb = jax.random.split(key)
    bound = 1.0 / jnp.sqrt(jnp.float32(fan_in))
    w = jax.random.uniform(kw, (fan_in, fan_out), dtype, -bound, bound)
    b = jax.random.uniform(kb, (fan_out,), dtype, -bound, bound)
    return w, b


def _check(out, x, w1, b1, w2, b2, atol_loose):
    # Matched-precision reference (bf16-rounded operands, f32 accumulation),
    # mirroring the MXU bf16 x bf16 -> f32 path.
    xb = x.astype(jnp.bfloat16).astype(jnp.float32)
    w1b = w1.astype(jnp.bfloat16).astype(jnp.float32)
    w2b = w2.astype(jnp.bfloat16).astype(jnp.float32)
    h = jnp.maximum(xb @ w1b + b1, 0.0)
    ref = h.astype(jnp.bfloat16).astype(jnp.float32) @ w2b + b2
    assert jnp.allclose(out, ref, atol=3e-3, rtol=3e-3), "matched-precision mismatch"
    # Loose check against the pure-f32 reference.
    ref_f32 = jnp.maximum(x @ w1 + b1, 0.0) @ w2 + b2
    assert jnp.allclose(out, ref_f32, atol=atol_loose, rtol=atol_loose), "f32 mismatch"


if __name__ == "__main__":
    key = jax.random.PRNGKey(0)

    # --- Test 1: small shapes, single hidden tile (weight-resident, Buffered(1)) ---
    in1, hid1, out1, batch1 = 32, 64, 16, 8
    kx, k1, k2, key = jax.random.split(key, 4)
    x = jax.random.normal(kx, (batch1, in1), jnp.float32)
    w1, b1 = _linear_init(k1, in1, hid1)
    w2, b2 = _linear_init(k2, hid1, out1)

    params = prepare_ffn_params(w1, b1, w2, b2)  # one-time weight prep (hoisted)
    out = jax.block_until_ready(feed_forward_prepared(x, params))
    assert out.shape == (batch1, out1)
    _check(out, x, w1, b1, w2, b2, atol_loose=5e-2)

    # --- Test 2: forced hidden-dim tiling (fc2 accumulation path across chunks) ---
    in2, hid2, out2, batch2 = 64, 512, 32, 24
    kx, k1, k2, key = jax.random.split(key, 4)
    x2 = jax.random.normal(kx, (batch2, in2), jnp.float32)
    w1_2, b1_2 = _linear_init(k1, in2, hid2)
    w2_2, b2_2 = _linear_init(k2, hid2, out2)

    out2_arr = jax.block_until_ready(
        feed_forward(x2, w1_2, b1_2, w2_2, b2_2, max_hidden_block=128))
    assert out2_arr.shape == (batch2, out2)
    _check(out2_arr, x2, w1_2, b1_2, w2_2, b2_2, atol_loose=1e-1)

    print("KERNEL_OK")
</pallas_src>

<mosaic_0001>
module attributes {stable_mosaic.version = 11 : i64} {
  func.func @_ffn_kernel(%arg0: i32, %arg1: i32, %arg2: memref<16x256xf32, #tpu.memory_space<vmem>>, %arg3: memref<256x256xbf16, #tpu.memory_space<vmem>>, %arg4: memref<1x256xf32, #tpu.memory_space<vmem>>, %arg5: memref<256x256xbf16, #tpu.memory_space<vmem>>, %arg6: memref<1x256xf32, #tpu.memory_space<vmem>>, %arg7: memref<16x256xf32, #tpu.memory_space<vmem>>, %arg8: memref<16x256xf32, #tpu.memory_space<vmem>>) attributes {dimension_semantics = [#tpu.dimension_semantics<parallel>, #tpu.dimension_semantics<arbitrary>], iteration_bounds = array<i64: 1, 1>, scalar_prefetch = 0 : i64, scratch_operands = 1 : i64, tpu.core_type = #tpu.core_type<tc>, window_params = [{transform_indices = @transform_0, window_bounds = array<i64: 16, 256>}, {pipeline_mode = #tpu.pipeline_mode<synchronous>, transform_indices = @transform_1, window_bounds = array<i64: 256, 256>}, {pipeline_mode = #tpu.pipeline_mode<synchronous>, transform_indices = @transform_2, window_bounds = array<i64: 1, 256>}, {pipeline_mode = #tpu.pipeline_mode<synchronous>, transform_indices = @transform_3, window_bounds = array<i64: 256, 256>}, {pipeline_mode = #tpu.pipeline_mode<synchronous>, transform_indices = @transform_4, window_bounds = array<i64: 1, 256>}, {transform_indices = @transform_5, window_bounds = array<i64: 16, 256>}]} {
    %c0_i32 = arith.constant 0 : i32
    %0 = arith.cmpi eq, %arg1, %c0_i32 : i32
    %1 = arith.extui %0 : i1 to i32
    %c0_i32_0 = arith.constant 0 : i32
    %2 = arith.cmpi ne, %1, %c0_i32_0 : i32
    scf.if %2 {
      %cst_16 = arith.constant 0.000000e+00 : f32
      %21 = vector.broadcast %cst_16 : f32 to vector<16x256xf32>
      %c0_17 = arith.constant 0 : index
      %c0_18 = arith.constant 0 : index
      %22 = vector.load %arg8[%c0_17, %c0_18] : memref<16x256xf32, #tpu.memory_space<vmem>>, vector<16x256xf32>
      tpu.vector_store %arg8[%c0_17, %c0_18], %21 {strides = array<i32>} : memref<16x256xf32, #tpu.memory_space<vmem>>, vector<16x256xf32>,
    } else {
    }
    %c0 = arith.constant 0 : index
    %c0_1 = arith.constant 0 : index
    %3 = vector.load %arg2[%c0, %c0_1] : memref<16x256xf32, #tpu.memory_space<vmem>>, vector<16x256xf32>
    %4 = arith.truncf %3 : vector<16x256xf32> to vector<16x256xbf16>
    %c0_2 = arith.constant 0 : index
    %c0_3 = arith.constant 0 : index
    %5 = vector.load %arg3[%c0_2, %c0_3] : memref<256x256xbf16, #tpu.memory_space<vmem>>, vector<256x256xbf16>
    %cst = arith.constant dense<0.000000e+00> : vector<16x256xf32>
    %6 = tpu.matmul %4, %5, %cst {dimension_numbers = #tpu.dot_dimension_numbers<[1], [0], [0], [1], [0, 0, 1, 1], [], []>} : vector<16x256xbf16>, vector<256x256xbf16>, vector<16x256xf32> -> vector<16x256xf32>
    %c0_4 = arith.constant 0 : index
    %c0_5 = arith.constant 0 : index
    %7 = vector.load %arg4[%c0_4, %c0_5] : memref<1x256xf32, #tpu.memory_space<vmem>>, vector<1x256xf32>
    %8 = vector.broadcast %7 : vector<1x256xf32> to vector<16x256xf32>
    %9 = arith.addf %6, %8 : vector<16x256xf32>
    %cst_6 = arith.constant 0.000000e+00 : f32
    %10 = vector.broadcast %cst_6 : f32 to vector<16x256xf32>
    %11 = arith.maximumf %9, %10 : vector<16x256xf32>
    %c0_7 = arith.constant 0 : index
    %c0_8 = arith.constant 0 : index
    %12 = vector.load %arg8[%c0_7, %c0_8] : memref<16x256xf32, #tpu.memory_space<vmem>>, vector<16x256xf32>
    %13 = arith.truncf %11 : vector<16x256xf32> to vector<16x256xbf16>
    %c0_9 = arith.constant 0 : index
    %c0_10 = arith.constant 0 : index
    %14 = vector.load %arg5[%c0_9, %c0_10] : memref<256x256xbf16, #tpu.memory_space<vmem>>, vector<256x256xbf16>
    %cst_11 = arith.constant dense<0.000000e+00> : vector<16x256xf32>
    %15 = tpu.matmul %13, %14, %cst_11 {dimension_numbers = #tpu.dot_dimension_numbers<[1], [0], [0], [1], [0, 0, 1, 1], [], []>} : vector<16x256xbf16>, vector<256x256xbf16>, vector<16x256xf32> -> vector<16x256xf32>
    %16 = arith.addf %12, %15 : vector<16x256xf32>
    %c0_12 = arith.constant 0 : index
    %c0_13 = arith.constant 0 : index
    %17 = vector.load %arg8[%c0_12, %c0_13] : memref<16x256xf32, #tpu.memory_space<vmem>>, vector<16x256xf32>
    tpu.vector_store %arg8[%c0_12, %c0_13], %16 {strides = array<i32>} : memref<16x256xf32, #tpu.memory_space<vmem>>, vector<16x256xf32>,
    %c0_i32_14 = arith.constant 0 : i32
    %18 = arith.cmpi eq, %arg1, %c0_i32_14 : i32
    %19 = arith.extui %18 : i1 to i32
    %c0_i32_15 = arith.constant 0 : i32
    %20 = arith.cmpi ne, %19, %c0_i32_15 : i32
    scf.if %20 {
      %c0_16 = arith.constant 0 : index
      %c0_17 = arith.constant 0 : index
      %21 = vector.load %arg8[%c0_16, %c0_17] : memref<16x256xf32, #tpu.memory_space<vmem>>, vector<16x256xf32>
      %c0_18 = arith.constant 0 : index
      %c0_19 = arith.constant 0 : index
      %22 = vector.load %arg6[%c0_18, %c0_19] : memref<1x256xf32, #tpu.memory_space<vmem>>, vector<1x256xf32>
      %23 = vector.broadcast %22 : vector<1x256xf32> to vector<16x256xf32>
      %24 = arith.addf %21, %23 : vector<16x256xf32>
      %c0_20 = arith.constant 0 : index
      %c0_21 = arith.constant 0 : index
      %25 = vector.load %arg7[%c0_20, %c0_21] : memref<16x256xf32, #tpu.memory_space<vmem>>, vector<16x256xf32>
      tpu.vector_store %arg7[%c0_20, %c0_21], %24 {strides = array<i32>} : memref<16x256xf32, #tpu.memory_space<vmem>>, vector<16x256xf32>,
    } else {
    }
    return
  }
  func.func @transform_0(%arg0: i32, %arg1: i32) -> (i32, i32) {
    %c0_i32 = arith.constant 0 : i32
    %c0_i32_0 = arith.constant 0 : i32
    return %arg0, %c0_i32 : i32, i32
  }
  func.func @transform_1(%arg0: i32, %arg1: i32) -> (i32, i32) {
    %c0_i32 = arith.constant 0 : i32
    %c0_i32_0 = arith.constant 0 : i32
    return %c0_i32, %arg1 : i32, i32
  }
  func.func @transform_2(%arg0: i32, %arg1: i32) -> (i32, i32) {
    %c0_i32 = arith.constant 0 : i32
    %c0_i32_0 = arith.constant 0 : i32
    return %c0_i32, %arg1 : i32, i32
  }
  func.func @transform_3(%arg0: i32, %arg1: i32) -> (i32, i32) {
    %c0_i32 = arith.constant 0 : i32
    %c0_i32_0 = arith.constant 0 : i32
    return %arg1, %c0_i32 : i32, i32
  }
  func.func @transform_4(%arg0: i32, %arg1: i32) -> (i32, i32) {
    %c0_i32 = arith.constant 0 : i32
    %c0_i32_0 = arith.constant 0 : i32
    %c0_i32_1 = arith.constant 0 : i32
    return %c0_i32, %c0_i32_0 : i32, i32
  }
  func.func @transform_5(%arg0: i32, %arg1: i32) -> (i32, i32) {
    %c0_i32 = arith.constant 0 : i32
    %c0_i32_0 = arith.constant 0 : i32
    return %arg0, %c0_i32 : i32, i32
  }
}

module attributes {stable_mosaic.version = 11 : i64} {
  func.func @_ffn_kernel(%arg0: i32, %arg1: i32, %arg2: memref<16x256xf32, #tpu.memory_space<vmem>>, %arg3: memref<256x256xbf16, #tpu.memory_space<vmem>>, %arg4: memref<1x256xf32, #tpu.memory_space<vmem>>, %arg5: memref<256x256xbf16, #tpu.memory_space<vmem>>, %arg6: memref<1x256xf32, #tpu.memory_space<vmem>>, %arg7: memref<16x256xf32, #tpu.memory_space<vmem>>, %arg8: memref<16x256xf32, #tpu.memory_space<vmem>>) attributes {dimension_semantics = [#tpu.dimension_semantics<parallel>, #tpu.dimension_semantics<arbitrary>], iteration_bounds = array<i64: 1, 1>, scalar_prefetch = 0 : i64, scratch_operands = 1 : i64, tpu.core_type = #tpu.core_type<tc>, window_params = [{transform_indices = @transform_0, window_bounds = array<i64: 16, 256>}, {transform_indices = @transform_1, window_bounds = array<i64: 256, 256>}, {transform_indices = @transform_2, window_bounds = array<i64: 1, 256>}, {transform_indices = @transform_3, window_bounds = array<i64: 256, 256>}, {pipeline_mode = #tpu.pipeline_mode<synchronous>, transform_indices = @transform_4, window_bounds = array<i64: 1, 256>}, {transform_indices = @transform_5, window_bounds = array<i64: 16, 256>}]} {
    %c0_i32 = arith.constant 0 : i32
    %0 = arith.cmpi eq, %arg1, %c0_i32 : i32
    %1 = arith.extui %0 : i1 to i32
    %c0_i32_0 = arith.constant 0 : i32
    %2 = arith.cmpi ne, %1, %c0_i32_0 : i32
    scf.if %2 {
      %cst_16 = arith.constant 0.000000e+00 : f32
      %21 = vector.broadcast %cst_16 : f32 to vector<16x256xf32>
      %c0_17 = arith.constant 0 : index
      %c0_18 = arith.constant 0 : index
      %22 = vector.load %arg8[%c0_17, %c0_18] : memref<16x256xf32, #tpu.memory_space<vmem>>, vector<16x256xf32>
      tpu.vector_store %arg8[%c0_17, %c0_18], %21 {strides = array<i32>} : memref<16x256xf32, #tpu.memory_space<vmem>>, vector<16x256xf32>,
    } else {
    }
    %c0 = arith.constant 0 : index
    %c0_1 = arith.constant 0 : index
    %3 = vector.load %arg2[%c0, %c0_1] : memref<16x256xf32, #tpu.memory_space<vmem>>, vector<16x256xf32>
    %4 = arith.truncf %3 : vector<16x256xf32> to vector<16x256xbf16>
    %c0_2 = arith.constant 0 : index
    %c0_3 = arith.constant 0 : index
    %5 = vector.load %arg3[%c0_2, %c0_3] : memref<256x256xbf16, #tpu.memory_space<vmem>>, vector<256x256xbf16>
    %cst = arith.constant dense<0.000000e+00> : vector<16x256xf32>
    %6 = tpu.matmul %4, %5, %cst {dimension_numbers = #tpu.dot_dimension_numbers<[1], [0], [0], [1], [0, 0, 1, 1], [], []>} : vector<16x256xbf16>, vector<256x256xbf16>, vector<16x256xf32> -> vector<16x256xf32>
    %c0_4 = arith.constant 0 : index
    %c0_5 = arith.constant 0 : index
    %7 = vector.load %arg4[%c0_4, %c0_5] : memref<1x256xf32, #tpu.memory_space<vmem>>, vector<1x256xf32>
    %8 = vector.broadcast %7 : vector<1x256xf32> to vector<16x256xf32>
    %9 = arith.addf %6, %8 : vector<16x256xf32>
    %cst_6 = arith.constant 0.000000e+00 : f32
    %10 = vector.broadcast %cst_6 : f32 to vector<16x256xf32>
    %11 = arith.maximumf %9, %10 : vector<16x256xf32>
    %c0_7 = arith.constant 0 : index
    %c0_8 = arith.constant 0 : index
    %12 = vector.load %arg8[%c0_7, %c0_8] : memref<16x256xf32, #tpu.memory_space<vmem>>, vector<16x256xf32>
    %13 = arith.truncf %11 : vector<16x256xf32> to vector<16x256xbf16>
    %c0_9 = arith.constant 0 : index
    %c0_10 = arith.constant 0 : index
    %14 = vector.load %arg5[%c0_9, %c0_10] : memref<256x256xbf16, #tpu.memory_space<vmem>>, vector<256x256xbf16>
    %cst_11 = arith.constant dense<0.000000e+00> : vector<16x256xf32>
    %15 = tpu.matmul %13, %14, %cst_11 {dimension_numbers = #tpu.dot_dimension_numbers<[1], [0], [0], [1], [0, 0, 1, 1], [], []>} : vector<16x256xbf16>, vector<256x256xbf16>, vector<16x256xf32> -> vector<16x256xf32>
    %16 = arith.addf %12, %15 : vector<16x256xf32>
    %c0_12 = arith.constant 0 : index
    %c0_13 = arith.constant 0 : index
    %17 = vector.load %arg8[%c0_12, %c0_13] : memref<16x256xf32, #tpu.memory_space<vmem>>, vector<16x256xf32>
    tpu.vector_store %arg8[%c0_12, %c0_13], %16 {strides = array<i32>} : memref<16x256xf32, #tpu.memory_space<vmem>>, vector<16x256xf32>,
    %c0_i32_14 = arith.constant 0 : i32
    %18 = arith.cmpi eq, %arg1, %c0_i32_14 : i32
    %19 = arith.extui %18 : i1 to i32
    %c0_i32_15 = arith.constant 0 : i32
    %20 = arith.cmpi ne, %19, %c0_i32_15 : i32
    scf.if %20 {
      %c0_16 = arith.constant 0 : index
      %c0_17 = arith.constant 0 : index
      %21 = vector.load %arg8[%c0_16, %c0_17] : memref<16x256xf32, #tpu.memory_space<vmem>>, vector<16x256xf32>
      %c0_18 = arith.constant 0 : index
      %c0_19 = arith.constant 0 : index
      %22 = vector.load %arg6[%c0_18, %c0_19] : memref<1x256xf32, #tpu.memory_space<vmem>>, vector<1x256xf32>
      %23 = vector.broadcast %22 : vector<1x256xf32> to vector<16x256xf32>
      %24 = arith.addf %21, %23 : vector<16x256xf32>
      %c0_20 = arith.constant 0 : index
      %c0_21 = arith.constant 0 : index
      %25 = vector.load %arg7[%c0_20, %c0_21] : memref<16x256xf32, #tpu.memory_space<vmem>>, vector<16x256xf32>
      tpu.vector_store %arg7[%c0_20, %c0_21], %24 {strides = array<i32>} : memref<16x256xf32, #tpu.memory_space<vmem>>, vector<16x256xf32>,
    } else {
    }
    return
  }
  func.func @transform_0(%arg0: i32, %arg1: i32) -> (i32, i32) {
    %c0_i32 = arith.constant 0 : i32
    %c0_i32_0 = arith.constant 0 : i32
    return %arg0, %c0_i32 : i32, i32
  }
  func.func @transform_1(%arg0: i32, %arg1: i32) -> (i32, i32) {
    %c0_i32 = arith.constant 0 : i32
    %c0_i32_0 = arith.constant 0 : i32
    return %c0_i32, %arg1 : i32, i32
  }
  func.func @transform_2(%arg0: i32, %arg1: i32) -> (i32, i32) {
    %c0_i32 = arith.constant 0 : i32
    %c0_i32_0 = arith.constant 0 : i32
    return %c0_i32, %arg1 : i32, i32
  }
  func.func @transform_3(%arg0: i32, %arg1: i32) -> (i32, i32) {
    %c0_i32 = arith.constant 0 : i32
    %c0_i32_0 = arith.constant 0 : i32
    return %arg1, %c0_i32 : i32, i32
  }
  func.func @transform_4(%arg0: i32, %arg1: i32) -> (i32, i32) {
    %c0_i32 = arith.constant 0 : i32
    %c0_i32_0 = arith.constant 0 : i32
    %c0_i32_1 = arith.constant 0 : i32
    return %c0_i32, %c0_i32_0 : i32, i32
  }
  func.func @transform_5(%arg0: i32, %arg1: i32) -> (i32, i32) {
    %c0_i32 = arith.constant 0 : i32
    %c0_i32_0 = arith.constant 0 : i32
    return %arg0, %c0_i32 : i32, i32
  }
}

</mosaic_0001>

<bundles_post_ra>
// kernel: tpu_custom_call.1
= control target key start
LH: loop header
LB: loop body
LE: loop exit
PB: predicated region body
PF: predicated region fallthrough
CT: control target
= control target key end

     0   :  { %10 = vsyncpa [#allocation4], 0  ;;  %s937_s0 = inlined_call_operand.hbm [shape: f32[16,256], index: 0, kind: input, shape index: {}]   ;;  %s938_s1 = inlined_call_operand.hbm [shape: bf16[256,256], index: 1, kind: input, shape index: {}]   ;;  %s939_s2 = inlined_call_operand.vmem [shape: f32[1,256], index: 2, kind: input, shape index: {}]   ;;  %s940_s3 = inlined_call_operand.hbm [shape: bf16[256,256], index: 3, kind: input, shape index: {}]   ;;  %s941_s4 = inlined_call_operand.vmem [shape: f32[1,256], index: 4, kind: input, shape index: {}]   ;;  %s942_s5 = inlined_call_operand.hbm [shape: f32[16,256], index: 5, kind: output, shape index: {}]  }
   0x1   :  { %11 = vsyncpa [#allocation7], 0 }
   0x2   :  { %12 = vsyncpa [#allocation5], 0  ;;  %s875_s18 = smov [#allocation6]  }
   0x3   :  { %s30_s19 = sshll.u32 %s875_s18, 4  ;;  %s31_s19 = int_to_ptr.vmem [resolvable:$true] %s30_s19 }
   0x4   :  { %s797_s20 = scalar_lea.vmem %s31_s19, 4096  ;;  %p802_p1 = scmp.lt.s32.totalorder %s31_s19, %s31_s19 }
   0x5   :  { %p798_p0 = scmp.ne.s32.totalorder %s31_s19, %s797_s20  ;;  %p803_p2 = scmp.lt.s32.totalorder %s797_s20, %s797_s20 }
   0x7   :  { %p804_p3 = por %p803_p2, %p802_p1 }
   0x9   :  { %p805_p4 = pnand %p804_p3, %p798_p0 }
   0xb   :  { %808 = shalt.err (!%p805_p4)
}
   0xc   :  { %s876_s21 = smov 128   ;;  %s877_s22 = smov 8  }
   0xd   :  { %36 = dma.hbm_to_vmem [thread:$0]  %s938_s1, 4096, %s31_s19, [#allocation7], %s876_s21, %s876_s21, %s877_s22  }
   0xe   :  { %s878_s25 = smov [#allocation3]  }
   0xf   :  { %s18_s26 = sshll.u32 %s878_s25, 4  ;;  %s19_s26 = int_to_ptr.vmem [resolvable:$true] %s18_s26 }
  0x10   :  { %s817_s27 = scalar_lea.vmem %s19_s26, 512  ;;  %p822_p6 = scmp.lt.s32.totalorder %s19_s26, %s19_s26 }
  0x11   :  { %p818_p5 = scmp.ne.s32.totalorder %s19_s26, %s817_s27  ;;  %p823_p7 = scmp.lt.s32.totalorder %s817_s27, %s817_s27 }
  0x13   :  { %p824_p8 = por %p823_p7, %p822_p6 }
  0x15   :  { %p825_p9 = pnand %p824_p8, %p818_p5 }
  0x17   :  { %828 = shalt.err (!%p825_p9)
}
  0x18   :  { %s879_s28 = smov 256   ;;  %s880_s29 = smov 16  }
  0x19   :  { %24 = dma.hbm_to_vmem [thread:$0]  %s937_s0, 512, %s19_s26, [#allocation4], %s879_s28, %s879_s28, %s880_s29  }
  0x1a   :  { %s881_s1 = smov [#allocation8]  }
  0x1b   :  { %s44_s7 = sshll.u32 %s881_s1, 4  ;;  %s45_s7 = int_to_ptr.vmem [resolvable:$true] %s44_s7 }
  0x1c   :  { %s837_s8 = scalar_lea.vmem %s45_s7, 4096  ;;  %p842_p11 = scmp.lt.s32.totalorder %s45_s7, %s45_s7 }
  0x1d   :  { %p838_p10 = scmp.ne.s32.totalorder %s45_s7, %s837_s8  ;;  %p843_p12 = scmp.lt.s32.totalorder %s837_s8, %s837_s8 }
  0x1f   :  { %p844_p13 = por %p843_p12, %p842_p11 }
  0x21   :  { %p845_p0 = pnand %p844_p13, %p838_p10 }
  0x23   :  { %848 = shalt.err (!%p845_p0)
}
  0x24   :  { %50 = dma.hbm_to_vmem [thread:$0]  %s940_s3, 4096, %s45_s7, [#allocation7], %s876_s21, %s876_s21, %s877_s22  }
  0x25   :  { %869 = dma.done.wait [#allocation4], 512  }
  0x26   :  { %870 = vsyncadd [#allocation4], 4294966784 }
  0x27   :  { %871 = dma.done.wait [#allocation7], 8192  }
  0x28   :  { %872 = vsyncadd [#allocation7], 4294959104  ;;  %v693_v0 = vld [vmem:[#allocation6 + $0x74] ss:$8 sps:$4 sm:$0xff]   ;;  %v695_v1 = vld [vmem:[#allocation6 + $0x70] ss:$8 sps:$4 sm:$0xff]  }
  0x29   :  { %280 = vmatprep.subr.bf16.mxu0 %v693_v0  ;;  %v696_v2 = vld [vmem:[#allocation6 + $0x64] ss:$8 sps:$4 sm:$0xff]   ;;  %v698_v3 = vld [vmem:[#allocation6 + $0x60] ss:$8 sps:$4 sm:$0xff]   ;;  %v699_v4 = vld [vmem:[#allocation6 + $0x54] ss:$8 sps:$4 sm:$0xff]  }
  0x2a   :  { %281 = vmatpush1.bf16.msra.mxu0 %v695_v1  ;;  %v701_v5 = vld [vmem:[#allocation6 + $0x50] ss:$8 sps:$4 sm:$0xff]   ;;  %v702_v6 = vld [vmem:[#allocation6 + $0x44] ss:$8 sps:$4 sm:$0xff]   ;;  %v704_v7 = vld [vmem:[#allocation6 + $0x40] ss:$8 sps:$4 sm:$0xff]  }
  0x2b   :  { %282 = vmatprep.subr.bf16.mxu0 %v696_v2  ;;  %v705_v8 = vld [vmem:[#allocation6 + $0x34] ss:$8 sps:$4 sm:$0xff]   ;;  %v707_v9 = vld [vmem:[#allocation6 + $0x30] ss:$8 sps:$4 sm:$0xff]   ;;  %v708_v10 = vld [vmem:[#allocation6 + $0x24] ss:$8 sps:$4 sm:$0xff]  }
  0x2c   :  { %v710_v11 = vld [vmem:[#allocation6 + $0x20] ss:$8 sps:$4 sm:$0xff]   ;;  %v711_v12 = vld [vmem:[#allocation6 + $0x14] ss:$8 sps:$4 sm:$0xff]   ;;  %v713_v15 = vld [vmem:[#allocation6 + $0x10] ss:$8 sps:$4 sm:$0xff]  }
  0x2d   :  { %v71_v13 = vld [vmem:[#allocation3 + $0x8] sm:$0xff]  ;;  %v73_v14 = vld [vmem:[#allocation3 + $0x18] sm:$0xff]  ;;  %v70_v55 = vld [vmem:[#allocation3] sm:$0xff]  ;;  %s882_s12 = smov [#allocation9]  }
  0x2e   :  { %283 = vmatpush1.bf16.msra.mxu0 %v698_v3  ;;  %v714_v16 = vld [vmem:[#allocation6 + $0x4] ss:$8 sps:$4 sm:$0xff]   ;;  %v75_v17 = vpack.c.bf16 %v73_v14, %v71_v13  ;;  %v741_v18 = vld [vmem:[#allocation8 + $0x74] ss:$8 sps:$4 sm:$0xff]   ;;  %v743_v19 = vld [vmem:[#allocation8 + $0x70] ss:$8 sps:$4 sm:$0xff]  }
  0x2f   :  { %284 = vmatprep.subr.bf16.mxu0 %v699_v4  ;;  %v744_v20 = vld [vmem:[#allocation8 + $0x64] ss:$8 sps:$4 sm:$0xff]   ;;  %525 = vmatprep.subr.bf16.mxu1 %v741_v18  ;;  %v746_v21 = vld [vmem:[#allocation8 + $0x60] ss:$8 sps:$4 sm:$0xff]   ;;  %v747_v23 = vld [vmem:[#allocation8 + $0x54] ss:$8 sps:$4 sm:$0xff]  }
  0x30   :  { %312 = vmatprep.mubr.bf16.mxu0 %v75_v17  ;;  %526 = vmatpush1.bf16.msra.mxu1 %v743_v19  ;;  %v716_v22 = vld [vmem:[#allocation6] ss:$8 sps:$4 sm:$0xff]   ;;  %v717_v24 = vld [vmem:[#allocation6 + $0xf4] ss:$8 sps:$4 sm:$0xff]   ;;  %v749_v25 = vld [vmem:[#allocation8 + $0x50] ss:$8 sps:$4 sm:$0xff]  }
  0x31   :  { %527 = vmatprep.subr.bf16.mxu1 %v744_v20  ;;  %v719_v26 = vld [vmem:[#allocation6 + $0xf0] ss:$8 sps:$4 sm:$0xff]   ;;  %v750_v27 = vld [vmem:[#allocation8 + $0x44] ss:$8 sps:$4 sm:$0xff]   ;;  %v752_v29 = vld [vmem:[#allocation8 + $0x40] ss:$8 sps:$4 sm:$0xff]  }
  0x32   :  { %285 = vmatpush1.bf16.msra.mxu0 %v701_v5  ;;  %v720_v28 = vld [vmem:[#allocation6 + $0xe4] ss:$8 sps:$4 sm:$0xff]   ;;  %v722_v30 = vld [vmem:[#allocation6 + $0xe0] ss:$8 sps:$4 sm:$0xff]   ;;  %v753_v31 = vld [vmem:[#allocation8 + $0x34] ss:$8 sps:$4 sm:$0xff]  }
  0x33   :  { %286 = vmatprep.subr.bf16.mxu0 %v702_v6  ;;  %v723_v32 = vld [vmem:[#allocation6 + $0xd4] ss:$8 sps:$4 sm:$0xff]   ;;  %v755_v33 = vld [vmem:[#allocation8 + $0x30] ss:$8 sps:$4 sm:$0xff]   ;;  %v756_v35 = vld [vmem:[#allocation8 + $0x24] ss:$8 sps:$4 sm:$0xff]   ;;  %v110_v6 = vlaneseq }
  0x34   :  { %528 = vmatpush1.bf16.msra.mxu1 %v746_v21  ;;  %v725_v34 = vld [vmem:[#allocation6 + $0xd0] ss:$8 sps:$4 sm:$0xff]   ;;  %v726_v36 = vld [vmem:[#allocation6 + $0xc4] ss:$8 sps:$4 sm:$0xff]   ;;  %v758_v37 = vld [vmem:[#allocation8 + $0x20] ss:$8 sps:$4 sm:$0xff]  }
  0x35   :  { %529 = vmatprep.subr.bf16.mxu1 %v747_v23  ;;  %v728_v38 = vld [vmem:[#allocation6 + $0xc0] ss:$8 sps:$4 sm:$0xff]   ;;  %v759_v39 = vld [vmem:[#allocation8 + $0x14] ss:$8 sps:$4 sm:$0xff]   ;;  %v761_v41 = vld [vmem:[#allocation8 + $0x10] ss:$8 sps:$4 sm:$0xff]  }
  0x36   :  { %287 = vmatpush1.bf16.msra.mxu0 %v704_v7  ;;  %v729_v40 = vld [vmem:[#allocation6 + $0xb4] ss:$8 sps:$4 sm:$0xff]   ;;  %v731_v42 = vld [vmem:[#allocation6 + $0xb0] ss:$8 sps:$4 sm:$0xff]   ;;  %v762_v43 = vld [vmem:[#allocation8 + $0x4] ss:$8 sps:$4 sm:$0xff]  }
  0x37   :  { %288 = vmatprep.subr.bf16.mxu0 %v705_v8  ;;  %v732_v44 = vld [vmem:[#allocation6 + $0xa4] ss:$8 sps:$4 sm:$0xff]   ;;  %v764_v45 = vld [vmem:[#allocation8] ss:$8 sps:$4 sm:$0xff]   ;;  %v765_v47 = vld [vmem:[#allocation8 + $0xf4] ss:$8 sps:$4 sm:$0xff]  }
  0x38   :  { %530 = vmatpush1.bf16.msra.mxu1 %v749_v25  ;;  %v734_v46 = vld [vmem:[#allocation6 + $0xa0] ss:$8 sps:$4 sm:$0xff]   ;;  %v735_v48 = vld [vmem:[#allocation6 + $0x94] ss:$8 sps:$4 sm:$0xff]   ;;  %v767_v49 = vld [vmem:[#allocation8 + $0xf0] ss:$8 sps:$4 sm:$0xff]  }
  0x39   :  { %531 = vmatprep.subr.bf16.mxu1 %v750_v27  ;;  %v737_v50 = vld [vmem:[#allocation6 + $0x90] ss:$8 sps:$4 sm:$0xff]   ;;  %v768_v51 = vld [vmem:[#allocation8 + $0xe4] ss:$8 sps:$4 sm:$0xff]   ;;  %v740_v53 = vld [vmem:[#allocation6 + $0x80] ss:$8 sps:$4 sm:$0xff]  }
  0x3a   :  { %289 = vmatpush1.bf16.msra.mxu0 %v707_v9  ;;  %v738_v52 = vld [vmem:[#allocation6 + $0x84] ss:$8 sps:$4 sm:$0xff]   ;;  %v770_v54 = vld [vmem:[#allocation8 + $0xe0] ss:$8 sps:$4 sm:$0xff]   ;;  %v72_v56 = vld [vmem:[#allocation3 + $0x10] sm:$0xff]  ;;  %v111_v7 = vshrl.u32 %v110_v6, 7 }
  0x3b   :  { %290 = vmatprep.subr.bf16.mxu0 %v708_v10  ;;  %v771_v57 = vld [vmem:[#allocation8 + $0xd4] ss:$8 sps:$4 sm:$0xff]   ;;  %v74_v58 = vpack.c.bf16 %v72_v56, %v70_v55  ;;  %v773_v59 = vld [vmem:[#allocation8 + $0xd0] ss:$8 sps:$4 sm:$0xff]   ;;  %v774_v60 = vld [vmem:[#allocation8 + $0xc4] ss:$8 sps:$4 sm:$0xff]  }
  0x3c   :  { %532 = vmatpush1.bf16.msra.mxu1 %v752_v29  ;;  %v776_v61 = vld [vmem:[#allocation8 + $0xc0] ss:$8 sps:$4 sm:$0xff]   ;;  %v777_v62 = vld [vmem:[#allocation8 + $0xb4] ss:$8 sps:$4 sm:$0xff]   ;;  %v779_v63 = vld [vmem:[#allocation8 + $0xb0] ss:$8 sps:$4 sm:$0xff]  }
  0x3d   :  { %533 = vmatprep.subr.bf16.mxu1 %v753_v31  ;;  %v780_v0 = vld [vmem:[#allocation8 + $0xa4] ss:$8 sps:$4 sm:$0xff]   ;;  %v782_v1 = vld [vmem:[#allocation8 + $0xa0] ss:$8 sps:$4 sm:$0xff]   ;;  %v783_v2 = vld [vmem:[#allocation8 + $0x94] ss:$8 sps:$4 sm:$0xff]  }
  0x3e   :  { %291 = vmatpush1.bf16.msra.mxu0 %v710_v11  ;;  %v785_v3 = vld [vmem:[#allocation8 + $0x90] ss:$8 sps:$4 sm:$0xff]   ;;  %v786_v4 = vld [vmem:[#allocation8 + $0x84] ss:$8 sps:$4 sm:$0xff]   ;;  %v788_v5 = vld [vmem:[#allocation8 + $0x80] ss:$8 sps:$4 sm:$0xff]  }
  0x3f   :  { %292 = vmatprep.subr.bf16.mxu0 %v711_v12  ;;  %v116_v8 = vsub.s32 1, %v111_v7  ;;  %v112_v9 = vsub.s32 0, %v111_v7  ;;  %v108_v10 = vld [vmem:[%s939_s2] sm:$0x3]  ;;  %s608_s13 = sshll.u32 %s882_s12, 4  ;;  %s609_s13 = int_to_ptr.vmem [resolvable:$true] %s608_s13 }
  0x40   :  { %534 = vmatpush1.bf16.msra.mxu1 %v755_v33  ;;  %v583_v27 = vld [vmem:[%s941_s4] sm:$0x3]  ;;  %s849_s14 = scalar_lea.vmem %s609_s13, 512  ;;  %p854_p2 = scmp.lt.s32.totalorder %s609_s13, %s609_s13 }
  0x41   :  { %535 = vmatprep.subr.bf16.mxu1 %v756_v35  ;;  %v117_v12 = vrot.slane %v108_v10, %v116_v8  ;;  %v113_v13 = vrot.slane %v108_v10, %v112_v9  ;;  %v592_v29 = vrot.slane %v583_v27, %v116_v8  ;;  %p850_p1 = scmp.ne.s32.totalorder %s609_s13, %s849_s14  ;;  %p855_p3 = scmp.lt.s32.totalorder %s849_s14, %s849_s14 }
  0x42   :  { %293 = vmatpush1.bf16.msra.mxu0 %v713_v15 }
  0x43   :  { %294 = vmatprep.subr.bf16.mxu0 %v714_v16  ;;  %p856_p4 = por %p855_p3, %p854_p2 }
  0x44   :  { %536 = vmatpush1.bf16.msra.mxu1 %v758_v37 }
  0x45   :  { %537 = vmatprep.subr.bf16.mxu1 %v759_v39  ;;  %p857_p5 = pnand %p856_p4, %p850_p1 }
  0x46   :  { %295 = vmatpush1.bf16.msra.mxu0 %v716_v22 }
  0x47   :  { %296 = vmatprep.subr.bf16.mxu0 %v717_v24 }
  0x48   :  { %538 = vmatpush1.bf16.msra.mxu1 %v761_v41 }
  0x49   :  { %539 = vmatprep.subr.bf16.mxu1 %v762_v43 }
  0x4a   :  { %297 = vmatpush2.bf16.msra.mxu0 %v719_v26 }
  0x4b   :  { %298 = vmatprep.subr.bf16.mxu0 %v720_v28  ;;  %v588_v28 = vrot.slane %v583_v27, %v112_v9 }
  0x4c   :  { %540 = vmatpush1.bf16.msra.mxu1 %v764_v45 }
  0x4d   :  { %541 = vmatprep.subr.bf16.mxu1 %v765_v47 }
  0x4e   :  { %299 = vmatpush2.bf16.msra.mxu0 %v722_v30 }
  0x4f   :  { %300 = vmatprep.subr.bf16.mxu0 %v723_v32 }
  0x50   :  { %542 = vmatpush2.bf16.msra.mxu1 %v767_v49 }
  0x51   :  { %543 = vmatprep.subr.bf16.mxu1 %v768_v51 }
  0x52   :  { %301 = vmatpush2.bf16.msra.mxu0 %v725_v34 }
  0x53   :  { %302 = vmatprep.subr.bf16.mxu0 %v726_v36 }
  0x54   :  { %544 = vmatpush2.bf16.msra.mxu1 %v770_v54 }
  0x55   :  { %545 = vmatprep.subr.bf16.mxu1 %v771_v57 }
  0x56   :  { %303 = vmatpush2.bf16.msra.mxu0 %v728_v38 }
  0x57   :  { %304 = vmatprep.subr.bf16.mxu0 %v729_v40 }
  0x58   :  { %546 = vmatpush2.bf16.msra.mxu1 %v773_v59 }
  0x59   :  { %547 = vmatprep.subr.bf16.mxu1 %v774_v60 }
  0x5a   :  { %305 = vmatpush2.bf16.msra.mxu0 %v731_v42 }
  0x5b   :  { %306 = vmatprep.subr.bf16.mxu0 %v732_v44 }
  0x5c   :  { %548 = vmatpush2.bf16.msra.mxu1 %v776_v61 }
  0x5d   :  { %549 = vmatprep.subr.bf16.mxu1 %v777_v62 }
  0x5e   :  { %307 = vmatpush2.bf16.msra.mxu0 %v734_v46 }
  0x5f   :  { %308 = vmatprep.subr.bf16.mxu0 %v735_v48 }
  0x60   :  { %550 = vmatpush2.bf16.msra.mxu1 %v779_v63 }
  0x61   :  { %551 = vmatprep.subr.bf16.mxu1 %v780_v0 }
  0x62   :  { %309 = vmatpush2.bf16.msra.mxu0 %v737_v50 }
  0x63   :  { %310 = vmatprep.subr.bf16.mxu0 %v738_v52 }
  0x64   :  { %552 = vmatpush2.bf16.msra.mxu1 %v782_v1 }
  0x65   :  { %553 = vmatprep.subr.bf16.mxu1 %v783_v2 }
  0x66   :  { %311 = vmatpush2.bf16.msra.mxu0 %v740_v53 }
  0x68   :  { %554 = vmatpush2.bf16.msra.mxu1 %v785_v3 }
  0x69   :  { %313 = vmatmul.mubr.bf16.vlgmr.msra.gmra.mxu0 %v74_v58  ;;  %555 = vmatprep.subr.bf16.mxu1 %v786_v4 }
  0x6c   :  { %556 = vmatpush2.bf16.msra.mxu1 %v788_v5 }
 0x129   :  { %v314_v11 = vpop.f32.mrf.mxu0 }
 0x12a   :  { %v315_v18 = vadd.f32 %v314_v11, %v113_v13 }
 0x12b   :  { %v316_v14 = vpop.f32.mrf.mxu0 }
 0x12c   :  { %v317_v16 = vadd.f32 %v316_v14, %v117_v12  ;;  %v323_v24 = vmax.f32 %v315_v18, 0.0 }
 0x12d   :  { %v318_v15 = vpop.f32.mrf.mxu0 }
 0x12e   :  { %v319_v17 = vadd.f32 %v318_v15, %v113_v13  ;;  %v324_v22 = vmax.f32 %v317_v16, 0.0 }
 0x12f   :  { %v320_v19 = vpop.f32.mrf.mxu0 }
 0x130   :  { %v321_v20 = vadd.f32 %v320_v19, %v117_v12  ;;  %v325_v21 = vmax.f32 %v319_v17, 0.0 }
 0x132   :  { %v326_v23 = vmax.f32 %v321_v20, 0.0  ;;  %v331_v26 = vpack.c.bf16 %v325_v21, %v323_v24 }
 0x134   :  { %v332_v25 = vpack.c.bf16 %v326_v23, %v324_v22 }
 0x136   :  { %557 = vmatprep.mubr.bf16.mxu1 %v332_v25 }
 0x137   :  { %558 = vmatmul.mubr.bf16.vlgmr.msra.gmra.mxu1 %v331_v26 }
 0x1f7   :  { %v559_v30 = vpop.f32.mrf.mxu1 }
 0x1f8   :  { %v595_v31 = vadd.f32 %v588_v28, %v559_v30 }
 0x1f9   :  { %v561_v32 = vpop.f32.mrf.mxu1 }
 0x1fa   :  { %599 = vst [vmem:[#allocation9] sm:$0xff] %v595_v31  ;;  %v596_v33 = vadd.f32 %v592_v29, %v561_v32 }
 0x1fb   :  { %v563_v34 = vpop.f32.mrf.mxu1 }
 0x1fc   :  { %600 = vst [vmem:[#allocation9 + $0x8] sm:$0xff] %v596_v33  ;;  %v597_v35 = vadd.f32 %v588_v28, %v563_v34 }
 0x1fd   :  { %v565_v36 = vpop.f32.mrf.mxu1 }
 0x1fe   :  { %601 = vst [vmem:[#allocation9 + $0x10] sm:$0xff] %v597_v35  ;;  %v598_v37 = vadd.f32 %v592_v29, %v565_v36 }
 0x200   :  { %602 = vst [vmem:[#allocation9 + $0x18] sm:$0xff] %v598_v37 }
 0x201   :  { %860 = shalt.err (!%p857_p5)
}
 0x202   :  { %614 = dma.vmem_to_hbm [thread:$0]  %s609_s13, 512, %s942_s5, [#allocation5], %s879_s28, %s879_s28, %s880_s29  }
 0x203   :  { %873 = dma.done.wait [#allocation5], 512  }
 0x204   :  { %874 = vsyncadd [#allocation5], 4294966784 }
 0x205   :  { %618 = vsyncpa [#allocation4], 1 }
 0x206   :  { %619 = vsyncpa [#allocation7], 1 }
 0x207   :  { %620 = vsyncpa [#allocation5], 1 }

// kernel: tpu_custom_call.1
= control target key start
LH: loop header
LB: loop body
LE: loop exit
PB: predicated region body
PF: predicated region fallthrough
CT: control target
= control target key end

     0   :  { %10 = vsyncpa [#allocation4], 0  ;;  %s937_s0 = inlined_call_operand.hbm [shape: f32[16,256], index: 0, kind: input, shape index: {}]   ;;  %s938_s1 = inlined_call_operand.hbm [shape: bf16[256,256], index: 1, kind: input, shape index: {}]   ;;  %s939_s2 = inlined_call_operand.vmem [shape: f32[1,256], index: 2, kind: input, shape index: {}]   ;;  %s940_s3 = inlined_call_operand.hbm [shape: bf16[256,256], index: 3, kind: input, shape index: {}]   ;;  %s941_s4 = inlined_call_operand.vmem [shape: f32[1,256], index: 4, kind: input, shape index: {}]   ;;  %s942_s5 = inlined_call_operand.hbm [shape: f32[16,256], index: 5, kind: output, shape index: {}]  }
   0x1   :  { %11 = vsyncpa [#allocation7], 0 }
   0x2   :  { %12 = vsyncpa [#allocation5], 0  ;;  %s875_s18 = smov [#allocation6]  }
   0x3   :  { %s30_s19 = sshll.u32 %s875_s18, 4  ;;  %s31_s19 = int_to_ptr.vmem [resolvable:$true] %s30_s19 }
   0x4   :  { %s797_s20 = scalar_lea.vmem %s31_s19, 4096  ;;  %p802_p1 = scmp.lt.s32.totalorder %s31_s19, %s31_s19 }
   0x5   :  { %p798_p0 = scmp.ne.s32.totalorder %s31_s19, %s797_s20  ;;  %p803_p2 = scmp.lt.s32.totalorder %s797_s20, %s797_s20 }
   0x7   :  { %p804_p3 = por %p803_p2, %p802_p1 }
   0x9   :  { %p805_p4 = pnand %p804_p3, %p798_p0 }
   0xb   :  { %808 = shalt.err (!%p805_p4)
}
   0xc   :  { %s876_s21 = smov 128   ;;  %s877_s22 = smov 8  }
   0xd   :  { %36 = dma.hbm_to_vmem [thread:$0]  %s938_s1, 4096, %s31_s19, [#allocation7], %s876_s21, %s876_s21, %s877_s22  }
   0xe   :  { %s878_s25 = smov [#allocation3]  }
   0xf   :  { %s18_s26 = sshll.u32 %s878_s25, 4  ;;  %s19_s26 = int_to_ptr.vmem [resolvable:$true] %s18_s26 }
  0x10   :  { %s817_s27 = scalar_lea.vmem %s19_s26, 512  ;;  %p822_p6 = scmp.lt.s32.totalorder %s19_s26, %s19_s26 }
  0x11   :  { %p818_p5 = scmp.ne.s32.totalorder %s19_s26, %s817_s27  ;;  %p823_p7 = scmp.lt.s32.totalorder %s817_s27, %s817_s27 }
  0x13   :  { %p824_p8 = por %p823_p7, %p822_p6 }
  0x15   :  { %p825_p9 = pnand %p824_p8, %p818_p5 }
  0x17   :  { %828 = shalt.err (!%p825_p9)
}
  0x18   :  { %s879_s28 = smov 256   ;;  %s880_s29 = smov 16  }
  0x19   :  { %24 = dma.hbm_to_vmem [thread:$0]  %s937_s0, 512, %s19_s26, [#allocation4], %s879_s28, %s879_s28, %s880_s29  }
  0x1a   :  { %s881_s1 = smov [#allocation8]  }
  0x1b   :  { %s44_s7 = sshll.u32 %s881_s1, 4  ;;  %s45_s7 = int_to_ptr.vmem [resolvable:$true] %s44_s7 }
  0x1c   :  { %s837_s8 = scalar_lea.vmem %s45_s7, 4096  ;;  %p842_p11 = scmp.lt.s32.totalorder %s45_s7, %s45_s7 }
  0x1d   :  { %p838_p10 = scmp.ne.s32.totalorder %s45_s7, %s837_s8  ;;  %p843_p12 = scmp.lt.s32.totalorder %s837_s8, %s837_s8 }
  0x1f   :  { %p844_p13 = por %p843_p12, %p842_p11 }
  0x21   :  { %p845_p0 = pnand %p844_p13, %p838_p10 }
  0x23   :  { %848 = shalt.err (!%p845_p0)
}
  0x24   :  { %50 = dma.hbm_to_vmem [thread:$0]  %s940_s3, 4096, %s45_s7, [#allocation7], %s876_s21, %s876_s21, %s877_s22  }
  0x25   :  { %869 = dma.done.wait [#allocation4], 512  }
  0x26   :  { %870 = vsyncadd [#allocation4], 4294966784 }
  0x27   :  { %871 = dma.done.wait [#allocation7], 8192  }
  0x28   :  { %872 = vsyncadd [#allocation7], 4294959104  ;;  %v693_v0 = vld [vmem:[#allocation6 + $0x74] ss:$8 sps:$4 sm:$0xff]   ;;  %v695_v1 = vld [vmem:[#allocation6 + $0x70] ss:$8 sps:$4 sm:$0xff]  }
  0x29   :  { %280 = vmatprep.subr.bf16.mxu0 %v693_v0  ;;  %v696_v2 = vld [vmem:[#allocation6 + $0x64] ss:$8 sps:$4 sm:$0xff]   ;;  %v698_v3 = vld [vmem:[#allocation6 + $0x60] ss:$8 sps:$4 sm:$0xff]   ;;  %v699_v4 = vld [vmem:[#allocation6 + $0x54] ss:$8 sps:$4 sm:$0xff]  }
  0x2a   :  { %281 = vmatpush1.bf16.msra.mxu0 %v695_v1  ;;  %v701_v5 = vld [vmem:[#allocation6 + $0x50] ss:$8 sps:$4 sm:$0xff]   ;;  %v702_v6 = vld [vmem:[#allocation6 + $0x44] ss:$8 sps:$4 sm:$0xff]   ;;  %v704_v7 = vld [vmem:[#allocation6 + $0x40] ss:$8 sps:$4 sm:$0xff]  }
  0x2b   :  { %282 = vmatprep.subr.bf16.mxu0 %v696_v2  ;;  %v705_v8 = vld [vmem:[#allocation6 + $0x34] ss:$8 sps:$4 sm:$0xff]   ;;  %v707_v9 = vld [vmem:[#allocation6 + $0x30] ss:$8 sps:$4 sm:$0xff]   ;;  %v708_v10 = vld [vmem:[#allocation6 + $0x24] ss:$8 sps:$4 sm:$0xff]  }
  0x2c   :  { %v710_v11 = vld [vmem:[#allocation6 + $0x20] ss:$8 sps:$4 sm:$0xff]   ;;  %v711_v12 = vld [vmem:[#allocation6 + $0x14] ss:$8 sps:$4 sm:$0xff]   ;;  %v713_v15 = vld [vmem:[#allocation6 + $0x10] ss:$8 sps:$4 sm:$0xff]  }
  0x2d   :  { %v71_v13 = vld [vmem:[#allocation3 + $0x8] sm:$0xff]  ;;  %v73_v14 = vld [vmem:[#allocation3 + $0x18] sm:$0xff]  ;;  %v70_v55 = vld [vmem:[#allocation3] sm:$0xff]  ;;  %s882_s12 = smov [#allocation9]  }
  0x2e   :  { %283 = vmatpush1.bf16.msra.mxu0 %v698_v3  ;;  %v714_v16 = vld [vmem:[#allocation6 + $0x4] ss:$8 sps:$4 sm:$0xff]   ;;  %v75_v17 = vpack.c.bf16 %v73_v14, %v71_v13  ;;  %v741_v18 = vld [vmem:[#allocation8 + $0x74] ss:$8 sps:$4 sm:$0xff]   ;;  %v743_v19 = vld [vmem:[#allocation8 + $0x70] ss:$8 sps:$4 sm:$0xff]  }
  0x2f   :  { %284 = vmatprep.subr.bf16.mxu0 %v699_v4  ;;  %v744_v20 = vld [vmem:[#allocation8 + $0x64] ss:$8 sps:$4 sm:$0xff]   ;;  %525 = vmatprep.subr.bf16.mxu1 %v741_v18  ;;  %v746_v21 = vld [vmem:[#allocation8 + $0x60] ss:$8 sps:$4 sm:$0xff]   ;;  %v747_v23 = vld [vmem:[#allocation8 + $0x54] ss:$8 sps:$4 sm:$0xff]  }
  0x30   :  { %312 = vmatprep.mubr.bf16.mxu0 %v75_v17  ;;  %526 = vmatpush1.bf16.msra.mxu1 %v743_v19  ;;  %v716_v22 = vld [vmem:[#allocation6] ss:$8 sps:$4 sm:$0xff]   ;;  %v717_v24 = vld [vmem:[#allocation6 + $0xf4] ss:$8 sps:$4 sm:$0xff]   ;;  %v749_v25 = vld [vmem:[#allocation8 + $0x50] ss:$8 sps:$4 sm:$0xff]  }
  0x31   :  { %527 = vmatprep.subr.bf16.mxu1 %v744_v20  ;;  %v719_v26 = vld [vmem:[#allocation6 + $0xf0] ss:$8 sps:$4 sm:$0xff]   ;;  %v750_v27 = vld [vmem:[#allocation8 + $0x44] ss:$8 sps:$4 sm:$0xff]   ;;  %v752_v29 = vld [vmem:[#allocation8 + $0x40] ss:$8 sps:$4 sm:$0xff]  }
  0x32   :  { %285 = vmatpush1.bf16.msra.mxu0 %v701_v5  ;;  %v720_v28 = vld [vmem:[#allocation6 + $0xe4] ss:$8 sps:$4 sm:$0xff]   ;;  %v722_v30 = vld [vmem:[#allocation6 + $0xe0] ss:$8 sps:$4 sm:$0xff]   ;;  %v753_v31 = vld [vmem:[#allocation8 + $0x34] ss:$8 sps:$4 sm:$0xff]  }
  0x33   :  { %286 = vmatprep.subr.bf16.mxu0 %v702_v6  ;;  %v723_v32 = vld [vmem:[#allocation6 + $0xd4] ss:$8 sps:$4 sm:$0xff]   ;;  %v755_v33 = vld [vmem:[#allocation8 + $0x30] ss:$8 sps:$4 sm:$0xff]   ;;  %v756_v35 = vld [vmem:[#allocation8 + $0x24] ss:$8 sps:$4 sm:$0xff]   ;;  %v110_v6 = vlaneseq }
  0x34   :  { %528 = vmatpush1.bf16.msra.mxu1 %v746_v21  ;;  %v725_v34 = vld [vmem:[#allocation6 + $0xd0] ss:$8 sps:$4 sm:$0xff]   ;;  %v726_v36 = vld [vmem:[#allocation6 + $0xc4] ss:$8 sps:$4 sm:$0xff]   ;;  %v758_v37 = vld [vmem:[#allocation8 + $0x20] ss:$8 sps:$4 sm:$0xff]  }
  0x35   :  { %529 = vmatprep.subr.bf16.mxu1 %v747_v23  ;;  %v728_v38 = vld [vmem:[#allocation6 + $0xc0] ss:$8 sps:$4 sm:$0xff]   ;;  %v759_v39 = vld [vmem:[#allocation8 + $0x14] ss:$8 sps:$4 sm:$0xff]   ;;  %v761_v41 = vld [vmem:[#allocation8 + $0x10] ss:$8 sps:$4 sm:$0xff]  }
  0x36   :  { %287 = vmatpush1.bf16.msra.mxu0 %v704_v7  ;;  %v729_v40 = vld [vmem:[#allocation6 + $0xb4] ss:$8 sps:$4 sm:$0xff]   ;;  %v731_v42 = vld [vmem:[#allocation6 + $0xb0] ss:$8 sps:$4 sm:$0xff]   ;;  %v762_v43 = vld [vmem:[#allocation8 + $0x4] ss:$8 sps:$4 sm:$0xff]  }
  0x37   :  { %288 = vmatprep.subr.bf16.mxu0 %v705_v8  ;;  %v732_v44 = vld [vmem:[#allocation6 + $0xa4] ss:$8 sps:$4 sm:$0xff]   ;;  %v764_v45 = vld [vmem:[#allocation8] ss:$8 sps:$4 sm:$0xff]   ;;  %v765_v47 = vld [vmem:[#allocation8 + $0xf4] ss:$8 sps:$4 sm:$0xff]  }
  0x38   :  { %530 = vmatpush1.bf16.msra.mxu1 %v749_v25  ;;  %v734_v46 = vld [vmem:[#allocation6 + $0xa0] ss:$8 sps:$4 sm:$0xff]   ;;  %v735_v48 = vld [vmem:[#allocation6 + $0x94] ss:$8 sps:$4 sm:$0xff]   ;;  %v767_v49 = vld [vmem:[#allocation8 + $0xf0] ss:$8 sps:$4 sm:$0xff]  }
  0x39   :  { %531 = vmatprep.subr.bf16.mxu1 %v750_v27  ;;  %v737_v50 = vld [vmem:[#allocation6 + $0x90] ss:$8 sps:$4 sm:$0xff]   ;;  %v768_v51 = vld [vmem:[#allocation8 + $0xe4] ss:$8 sps:$4 sm:$0xff]   ;;  %v740_v53 = vld [vmem:[#allocation6 + $0x80] ss:$8 sps:$4 sm:$0xff]  }
  0x3a   :  { %289 = vmatpush1.bf16.msra.mxu0 %v707_v9  ;;  %v738_v52 = vld [vmem:[#allocation6 + $0x84] ss:$8 sps:$4 sm:$0xff]   ;;  %v770_v54 = vld [vmem:[#allocation8 + $0xe0] ss:$8 sps:$4 sm:$0xff]   ;;  %v72_v56 = vld [vmem:[#allocation3 + $0x10] sm:$0xff]  ;;  %v111_v7 = vshrl.u32 %v110_v6, 7 }
  0x3b   :  { %290 = vmatprep.subr.bf16.mxu0 %v708_v10  ;;  %v771_v57 = vld [vmem:[#allocation8 + $0xd4] ss:$8 sps:$4 sm:$0xff]   ;;  %v74_v58 = vpack.c.bf16 %v72_v56, %v70_v55  ;;  %v773_v59 = vld [vmem:[#allocation8 + $0xd0] ss:$8 sps:$4 sm:$0xff]   ;;  %v774_v60 = vld [vmem:[#allocation8 + $0xc4] ss:$8 sps:$4 sm:$0xff]  }
  0x3c   :  { %532 = vmatpush1.bf16.msra.mxu1 %v752_v29  ;;  %v776_v61 = vld [vmem:[#allocation8 + $0xc0] ss:$8 sps:$4 sm:$0xff]   ;;  %v777_v62 = vld [vmem:[#allocation8 + $0xb4] ss:$8 sps:$4 sm:$0xff]   ;;  %v779_v63 = vld [vmem:[#allocation8 + $0xb0] ss:$8 sps:$4 sm:$0xff]  }
  0x3d   :  { %533 = vmatprep.subr.bf16.mxu1 %v753_v31  ;;  %v780_v0 = vld [vmem:[#allocation8 + $0xa4] ss:$8 sps:$4 sm:$0xff]   ;;  %v782_v1 = vld [vmem:[#allocation8 + $0xa0] ss:$8 sps:$4 sm:$0xff]   ;;  %v783_v2 = vld [vmem:[#allocation8 + $0x94] ss:$8 sps:$4 sm:$0xff]  }
  0x3e   :  { %291 = vmatpush1.bf16.msra.mxu0 %v710_v11  ;;  %v785_v3 = vld [vmem:[#allocation8 + $0x90] ss:$8 sps:$4 sm:$0xff]   ;;  %v786_v4 = vld [vmem:[#allocation8 + $0x84] ss:$8 sps:$4 sm:$0xff]   ;;  %v788_v5 = vld [vmem:[#allocation8 + $0x80] ss:$8 sps:$4 sm:$0xff]  }
  0x3f   :  { %292 = vmatprep.subr.bf16.mxu0 %v711_v12  ;;  %v116_v8 = vsub.s32 1, %v111_v7  ;;  %v112_v9 = vsub.s32 0, %v111_v7  ;;  %v108_v10 = vld [vmem:[%s939_s2] sm:$0x3]  ;;  %s608_s13 = sshll.u32 %s882_s12, 4  ;;  %s609_s13 = int_to_ptr.vmem [resolvable:$true] %s608_s13 }
  0x40   :  { %534 = vmatpush1.bf16.msra.mxu1 %v755_v33  ;;  %v583_v27 = vld [vmem:[%s941_s4] sm:$0x3]  ;;  %s849_s14 = scalar_lea.vmem %s609_s13, 512  ;;  %p854_p2 = scmp.lt.s32.totalorder %s609_s13, %s609_s13 }
  0x41   :  { %535 = vmatprep.subr.bf16.mxu1 %v756_v35  ;;  %v117_v12 = vrot.slane %v108_v10, %v116_v8  ;;  %v113_v13 = vrot.slane %v108_v10, %v112_v9  ;;  %v592_v29 = vrot.slane %v583_v27, %v116_v8  ;;  %p850_p1 = scmp.ne.s32.totalorder %s609_s13, %s849_s14  ;;  %p855_p3 = scmp.lt.s32.totalorder %s849_s14, %s849_s14 }
  0x42   :  { %293 = vmatpush1.bf16.msra.mxu0 %v713_v15 }
  0x43   :  { %294 = vmatprep.subr.bf16.mxu0 %v714_v16  ;;  %p856_p4 = por %p855_p3, %p854_p2 }
  0x44   :  { %536 = vmatpush1.bf16.msra.mxu1 %v758_v37 }
  0x45   :  { %537 = vmatprep.subr.bf16.mxu1 %v759_v39  ;;  %p857_p5 = pnand %p856_p4, %p850_p1 }
  0x46   :  { %295 = vmatpush1.bf16.msra.mxu0 %v716_v22 }
  0x47   :  { %296 = vmatprep.subr.bf16.mxu0 %v717_v24 }
  0x48   :  { %538 = vmatpush1.bf16.msra.mxu1 %v761_v41 }
  0x49   :  { %539 = vmatprep.subr.bf16.mxu1 %v762_v43 }
  0x4a   :  { %297 = vmatpush2.bf16.msra.mxu0 %v719_v26 }
  0x4b   :  { %298 = vmatprep.subr.bf16.mxu0 %v720_v28  ;;  %v588_v28 = vrot.slane %v583_v27, %v112_v9 }
  0x4c   :  { %540 = vmatpush1.bf16.msra.mxu1 %v764_v45 }
  0x4d   :  { %541 = vmatprep.subr.bf16.mxu1 %v765_v47 }
  0x4e   :  { %299 = vmatpush2.bf16.msra.mxu0 %v722_v30 }
  0x4f   :  { %300 = vmatprep.subr.bf16.mxu0 %v723_v32 }
  0x50   :  { %542 = vmatpush2.bf16.msra.mxu1 %v767_v49 }
  0x51   :  { %543 = vmatprep.subr.bf16.mxu1 %v768_v51 }
  0x52   :  { %301 = vmatpush2.bf16.msra.mxu0 %v725_v34 }
  0x53   :  { %302 = vmatprep.subr.bf16.mxu0 %v726_v36 }
  0x54   :  { %544 = vmatpush2.bf16.msra.mxu1 %v770_v54 }
  0x55   :  { %545 = vmatprep.subr.bf16.mxu1 %v771_v57 }
  0x56   :  { %303 = vmatpush2.bf16.msra.mxu0 %v728_v38 }
  0x57   :  { %304 = vmatprep.subr.bf16.mxu0 %v729_v40 }
  0x58   :  { %546 = vmatpush2.bf16.msra.mxu1 %v773_v59 }
  0x59   :  { %547 = vmatprep.subr.bf16.mxu1 %v774_v60 }
  0x5a   :  { %305 = vmatpush2.bf16.msra.mxu0 %v731_v42 }
  0x5b   :  { %306 = vmatprep.subr.bf16.mxu0 %v732_v44 }
  0x5c   :  { %548 = vmatpush2.bf16.msra.mxu1 %v776_v61 }
  0x5d   :  { %549 = vmatprep.subr.bf16.mxu1 %v777_v62 }
  0x5e   :  { %307 = vmatpush2.bf16.msra.mxu0 %v734_v46 }
  0x5f   :  { %308 = vmatprep.subr.bf16.mxu0 %v735_v48 }
  0x60   :  { %550 = vmatpush2.bf16.msra.mxu1 %v779_v63 }
  0x61   :  { %551 = vmatprep.subr.bf16.mxu1 %v780_v0 }
  0x62   :  { %309 = vmatpush2.bf16.msra.mxu0 %v737_v50 }
  0x63   :  { %310 = vmatprep.subr.bf16.mxu0 %v738_v52 }
  0x64   :  { %552 = vmatpush2.bf16.msra.mxu1 %v782_v1 }
  0x65   :  { %553 = vmatprep.subr.bf16.mxu1 %v783_v2 }
  0x66   :  { %311 = vmatpush2.bf16.msra.mxu0 %v740_v53 }
  0x68   :  { %554 = vmatpush2.bf16.msra.mxu1 %v785_v3 }
  0x69   :  { %313 = vmatmul.mubr.bf16.vlgmr.msra.gmra.mxu0 %v74_v58  ;;  %555 = vmatprep.subr.bf16.mxu1 %v786_v4 }
  0x6c   :  { %556 = vmatpush2.bf16.msra.mxu1 %v788_v5 }
 0x129   :  { %v314_v11 = vpop.f32.mrf.mxu0 }
 0x12a   :  { %v315_v18 = vadd.f32 %v314_v11, %v113_v13 }
 0x12b   :  { %v316_v14 = vpop.f32.mrf.mxu0 }
 0x12c   :  { %v317_v16 = vadd.f32 %v316_v14, %v117_v12  ;;  %v323_v24 = vmax.f32 %v315_v18, 0.0 }
 0x12d   :  { %v318_v15 = vpop.f32.mrf.mxu0 }
 0x12e   :  { %v319_v17 = vadd.f32 %v318_v15, %v113_v13  ;;  %v324_v22 = vmax.f32 %v317_v16, 0.0 }
 0x12f   :  { %v320_v19 = vpop.f32.mrf.mxu0 }
 0x130   :  { %v321_v20 = vadd.f32 %v320_v19, %v117_v12  ;;  %v325_v21 = vmax.f32 %v319_v17, 0.0 }
 0x132   :  { %v326_v23 = vmax.f32 %v321_v20, 0.0  ;;  %v331_v26 = vpack.c.bf16 %v325_v21, %v323_v24 }
 0x134   :  { %v332_v25 = vpack.c.bf16 %v326_v23, %v324_v22 }
 0x136   :  { %557 = vmatprep.mubr.bf16.mxu1 %v332_v25 }
 0x137   :  { %558 = vmatmul.mubr.bf16.vlgmr.msra.gmra.mxu1 %v331_v26 }
 0x1f7   :  { %v559_v30 = vpop.f32.mrf.mxu1 }
 0x1f8   :  { %v595_v31 = vadd.f32 %v588_v28, %v559_v30 }
 0x1f9   :  { %v561_v32 = vpop.f32.mrf.mxu1 }
 0x1fa   :  { %599 = vst [vmem:[#allocation9] sm:$0xff] %v595_v31  ;;  %v596_v33 = vadd.f32 %v592_v29, %v561_v32 }
 0x1fb   :  { %v563_v34 = vpop.f32.mrf.mxu1 }
 0x1fc   :  { %600 = vst [vmem:[#allocation9 + $0x8] sm:$0xff] %v596_v33  ;;  %v597_v35 = vadd.f32 %v588_v28, %v563_v34 }
 0x1fd   :  { %v565_v36 = vpop.f32.mrf.mxu1 }
 0x1fe   :  { %601 = vst [vmem:[#allocation9 + $0x10] sm:$0xff] %v597_v35  ;;  %v598_v37 = vadd.f32 %v592_v29, %v565_v36 }
 0x200   :  { %602 = vst [vmem:[#allocation9 + $0x18] sm:$0xff] %v598_v37 }
 0x201   :  { %860 = shalt.err (!%p857_p5)
}
 0x202   :  { %614 = dma.vmem_to_hbm [thread:$0]  %s609_s13, 512, %s942_s5, [#allocation5], %s879_s28, %s879_s28, %s880_s29  }
 0x203   :  { %873 = dma.done.wait [#allocation5], 512  }
 0x204   :  { %874 = vsyncadd [#allocation5], 4294966784 }
 0x205   :  { %618 = vsyncpa [#allocation4], 1 }
 0x206   :  { %619 = vsyncpa [#allocation7], 1 }
 0x207   :  { %620 = vsyncpa [#allocation5], 1 }

</bundles_post_ra>
